<compile_context>
chip_gen: v7x
topology: tpu7x:2x2x1
jax: 0.10.0
libtpu: 0.0.40
codegen_flags: <defaults>
</compile_context>

<pallas_src>
import functools

import jax
import jax.numpy as jnp
from jax.experimental import pallas as pl
from jax.experimental.pallas import tpu as pltpu


_SUPPORTED_DTYPES = (jnp.float32, jnp.bfloat16, jnp.int32, jnp.uint32)


def _pixel_shuffle_kernel(x_ref, p_ref, o_ref):
    """One (n, cc, H-tile, r1-group, W-tile) grid step.

    x_ref: (K, tH, tW)    input planes for this step.
    p_ref: (K*tW, outC)   bf16 scatter matrix (exactly one 1 per row).
    o_ref: (tH, outC)     lane-dense output chunk.
    """
    K, tH, tW = x_ref.shape
    outC = o_ref.shape[-1]

    if o_ref.dtype == jnp.bfloat16:
        # Native MXU path: every output lane receives exactly one product
        # value*1 (plus zeros); f32 accumulation -> exact for finite bf16.
        acc = jnp.zeros((tH, outC), jnp.float32)
        for k in range(K):
            acc = acc + jnp.dot(x_ref[k], p_ref[k * tW:(k + 1) * tW, :],
                                preferred_element_type=jnp.float32)
        o_ref[...] = acc.astype(o_ref.dtype)
    else:
        # 32-bit dtypes: permute the raw bits one byte plane at a time
        # (0..255 is bf16-exact) -> bit-exact incl. NaN/Inf/subnormals.
        planes = []
        for k in range(K):
            v = x_ref[k]
            planes.append(v if v.dtype == jnp.int32
                          else pltpu.bitcast(v, jnp.int32))
        out_bits = None
        for b in range(4):
            acc = jnp.zeros((tH, outC), jnp.float32)
            for k in range(K):
                byte = ((planes[k] >> (8 * b)) & 0xFF)
                byte = byte.astype(jnp.float32).astype(jnp.bfloat16)
                acc = acc + jnp.dot(byte, p_ref[k * tW:(k + 1) * tW, :],
                                    preferred_element_type=jnp.float32)
            plane_bits = acc.astype(jnp.int32) << (8 * b)
            out_bits = plane_bits if out_bits is None else out_bits | plane_bits
        if o_ref.dtype == jnp.int32:
            o_ref[...] = out_bits
        else:
            o_ref[...] = pltpu.bitcast(out_bits, o_ref.dtype)


def _pick_tile_w(W, r):
    """Lane tile tW (a divisor of W) giving legal, lane-dense BlockSpecs."""
    if W % 128 == 0:
        return 128            # output chunk = 128*r lanes, input tile 128 lanes
    if (W * r) % 128 == 0:
        return W              # whole-W tile; output chunk still 128-aligned
    return None               # no legal lane tile -> full-width fallback


def _pick_tile_h(H, K, tW, outC, itemsize, budget_bytes=20 * 1024 * 1024):
    """Largest H tile (divisor of H, multiple of 8 when < H, capped at 512)
    whose real per-step VMEM footprint fits the budget on every generation."""
    def footprint(th):
        in_blk = K * th * tW * itemsize
        out_blk = th * outC * itemsize
        p_blk = K * tW * outC * 2                 # bf16 permutation matrix
        return 2 * (in_blk + out_blk + p_blk)     # everything double-buffered

    cands = sorted({d for d in range(8, H + 1, 8) if H % d == 0} | {H})
    best = None
    for d in cands:                                # ascending; keep the largest fit
        if d <= 512 and footprint(d) <= budget_bytes:
            best = d
    if best is None:
        best = cands[0]
    return best, footprint(best)


def pixel_shuffle_align(x, upscale_factor=1, mode="caffe"):
    if x.ndim != 4:
        raise ValueError(f"input tensor shape {x.shape} is not supported.")
    if mode not in ("caffe", "pytorch"):
        raise NotImplementedError(f"{mode} mode is not implemented")
    r = int(upscale_factor)
    if r < 1:
        raise ValueError("upscale_factor must be >= 1")
    N, C, H, W = x.shape
    if C % (r * r) != 0:
        raise ValueError(f"C={C} not divisible by upscale_factor**2={r * r}")
    if r == 1:
        return x                                   # identity; skip the kernel
    if jnp.dtype(x.dtype) not in [jnp.dtype(d) for d in _SUPPORTED_DTYPES]:
        # TODO(synk): 16-bit non-bf16 / 8-bit dtypes need a narrower bit-plane
        # split (or the XLU permute path); not implemented.
        raise NotImplementedError(f"dtype {x.dtype} is not supported")
    c = C // (r * r)
    itemsize = jnp.dtype(x.dtype).itemsize

    # ---- tiling -------------------------------------------------------------
    tW = _pick_tile_w(W, r)
    if tW is None:
        # Fallback (W*r not 128-aligned, e.g. small W): process all r*r planes
        # per step so the output block spans the full r*W*r last dim (legal
        # for any W).
        tW, K, G = W, r * r, 1
    else:
        K, G = r, r             # one r1 per step, r planes (all r2) per step
    outC = K * tW               # output lanes written per step
    wb = W // tW                # lane tiles per row
    tH, fp = _pick_tile_h(H, K, tW, outC, itemsize)
    vmem_limit = None
    if fp > 28 * 1024 * 1024:
        # TODO(synk): very large W that is not 128-aligned can still exceed
        # v7x's 64 MiB VMEM; needs ragged W tiling.
        vmem_limit = int(min(fp + (8 << 20), 100 << 20))

    # ---- free wrapper reshape: expose the r*r planes per output channel -----
    if mode == "caffe":
        x5 = x.reshape(N, r * r, c, H, W)          # plane k=r1*r+r2 -> ch k*c+cc
        x_spec = pl.BlockSpec((None, K, None, tH, tW),
                              lambda n, cc, t, g, s: (n, g, cc, t, s))
    else:  # pytorch
        x5 = x.reshape(N, c, r * r, H, W)          # plane k -> ch cc*r*r + k
        x_spec = pl.BlockSpec((None, None, K, tH, tW),
                              lambda n, cc, t, g, s: (n, cc, g, t, s))

    # Scatter matrix: row k*tW + w  ->  column (k//r)*(tW*r) + w*r + (k%r).
    # (Tiled case: k = r2, r1 comes from the grid.  Fallback: k = r1*r + r2.)
    kk = jnp.arange(K * tW)
    k_idx, w_idx = kk // tW, kk % tW
    col = (k_idx // r) * (tW * r) + w_idx * r + (k_idx % r)
    p_cat = (jnp.arange(outC)[None, :] == col[:, None]).astype(jnp.bfloat16)
    p_spec = pl.BlockSpec((K * tW, outC), lambda n, cc, t, g, s: (0, 0))

    # Output slab (N, c, H, r*W*r): lane index = r1*(W*r) + w*r + r2, so the
    # final reshape to (N, c, H*r, W*r) is a contiguous (free) collapse.
    out_spec = pl.BlockSpec((None, None, tH, outC),
                            lambda n, cc, t, g, s: (n, cc, t, g * wb + s))

    grid = (N, c, H // tH, G, wb)
    n_passes = 1 if x.dtype == jnp.bfloat16 else 4
    steps = N * c * (H // tH) * G * wb
    cost = pl.CostEstimate(
        flops=int(2 * steps * n_passes * K * tH * tW * outC),
        transcendentals=0,
        bytes_accessed=int(2 * N * C * H * W * itemsize + K * tW * outC * 2))

    out = pl.pallas_call(
        _pixel_shuffle_kernel,
        out_shape=jax.ShapeDtypeStruct((N, c, H, r * W * r), x.dtype),
        grid=grid,
        in_specs=[x_spec, p_spec],
        out_specs=out_spec,
        compiler_params=pltpu.CompilerParams(
            dimension_semantics=("parallel",) * len(grid),
            vmem_limit_bytes=vmem_limit),
        cost_estimate=cost,
    )(x5, p_cat)

    return out.reshape(N, c, H * r, W * r)


def _reference(x, r, mode):
    """Pure-JAX reference mirroring the PyTorch forward exactly."""
    N, C, H, W = x.shape
    c = C // (r * r)
    if mode == "caffe":
        y = x.reshape(N, r, r, c, H, W).transpose(0, 3, 4, 1, 5, 2)
    else:
        y = x.reshape(N, c, r, r, H, W).transpose(0, 1, 4, 2, 5, 3)
    return y.reshape(N, c, H * r, W * r)


if __name__ == "__main__":
    key = jax.random.PRNGKey(0)
    k1, k2, k3 = jax.random.split(key, 3)

    def check(x, r, mode):
        fn = jax.jit(functools.partial(pixel_shuffle_align,
                                       upscale_factor=r, mode=mode))
        out = jax.block_until_ready(fn(x))
        ref = _reference(x, r, mode)
        return (out.shape == ref.shape and out.dtype == ref.dtype
                and bool(jnp.array_equal(out, ref)))          # bit-exact

    # Full-width fallback path (W*r not 128-aligned).
    x_small = jax.random.normal(k1, (2, 8, 16, 16), dtype=jnp.float32)
    # Lane-tiled fast path (W % 128 == 0).
    x_wide = jax.random.normal(k2, (1, 4, 16, 128), dtype=jnp.float32)
    # r = 3, int32 (byte-plane bit-exact path), lane-tiled.
    x_int = jax.lax.bitcast_convert_type(
        jax.random.normal(k3, (1, 9, 8, 128), dtype=jnp.float32), jnp.int32)

    ok = True
    ok &= check(x_small, 2, "caffe")                          # f32, fallback
    ok &= check(x_small.astype(jnp.bfloat16), 2, "pytorch")   # bf16, fallback
    ok &= check(x_wide.astype(jnp.bfloat16), 2, "caffe")      # bf16, lane-tiled
    ok &= check(x_wide, 2, "pytorch")                         # f32, lane-tiled
    ok &= check(x_int, 3, "caffe")                            # i32, r = 3
    ok &= check(x_small, 1, "caffe")                          # r = 1 identity

    print("KERNEL_OK" if ok else "KERNEL_FAILED")
</pallas_src>

<mosaic_0001>
module attributes {stable_mosaic.version = 11 : i64} {
  func.func @_pixel_shuffle_kernel(%arg0: i32, %arg1: i32, %arg2: i32, %arg3: i32, %arg4: i32, %arg5: memref<1x4x1x16x16xf32, #tpu.memory_space<vmem>>, %arg6: memref<64x64xbf16, #tpu.memory_space<vmem>>, %arg7: memref<1x1x16x64xf32, #tpu.memory_space<vmem>>) attributes {dimension_semantics = [#tpu.dimension_semantics<parallel>, #tpu.dimension_semantics<parallel>, #tpu.dimension_semantics<parallel>, #tpu.dimension_semantics<parallel>, #tpu.dimension_semantics<parallel>], iteration_bounds = array<i64: 2, 2, 1, 1, 1>, scalar_prefetch = 0 : i64, scratch_operands = 0 : i64, tpu.core_type = #tpu.core_type<tc>, window_params = [{transform_indices = @transform_0, window_bounds = array<i64: 1, 4, 1, 16, 16>}, {pipeline_mode = #tpu.pipeline_mode<synchronous>, transform_indices = @transform_1, window_bounds = array<i64: 64, 64>}, {transform_indices = @transform_2, window_bounds = array<i64: 1, 1, 16, 64>}]} {
    %c0 = arith.constant 0 : index
    %c0_0 = arith.constant 0 : index
    %c0_1 = arith.constant 0 : index
    %c0_2 = arith.constant 0 : index
    %c0_3 = arith.constant 0 : index
    %0 = vector.load %arg5[%c0, %c0_0, %c0_1, %c0_2, %c0_3] : memref<1x4x1x16x16xf32, #tpu.memory_space<vmem>>, vector<1x1x1x16x16xf32>
    %1 = vector.shape_cast %0 : vector<1x1x1x16x16xf32> to vector<16x16xf32>
    %2 = tpu.bitcast %1 : vector<16x16xf32> -> vector<16x16xi32>
    %c0_4 = arith.constant 0 : index
    %c1 = arith.constant 1 : index
    %c0_5 = arith.constant 0 : index
    %c0_6 = arith.constant 0 : index
    %c0_7 = arith.constant 0 : index
    %3 = vector.load %arg5[%c0_4, %c1, %c0_5, %c0_6, %c0_7] : memref<1x4x1x16x16xf32, #tpu.memory_space<vmem>>, vector<1x1x1x16x16xf32>
    %4 = vector.shape_cast %3 : vector<1x1x1x16x16xf32> to vector<16x16xf32>
    %5 = tpu.bitcast %4 : vector<16x16xf32> -> vector<16x16xi32>
    %c0_8 = arith.constant 0 : index
    %c2 = arith.constant 2 : index
    %c0_9 = arith.constant 0 : index
    %c0_10 = arith.constant 0 : index
    %c0_11 = arith.constant 0 : index
    %6 = vector.load %arg5[%c0_8, %c2, %c0_9, %c0_10, %c0_11] : memref<1x4x1x16x16xf32, #tpu.memory_space<vmem>>, vector<1x1x1x16x16xf32>
    %7 = vector.shape_cast %6 : vector<1x1x1x16x16xf32> to vector<16x16xf32>
    %8 = tpu.bitcast %7 : vector<16x16xf32> -> vector<16x16xi32>
    %c0_12 = arith.constant 0 : index
    %c3 = arith.constant 3 : index
    %c0_13 = arith.constant 0 : index
    %c0_14 = arith.constant 0 : index
    %c0_15 = arith.constant 0 : index
    %9 = vector.load %arg5[%c0_12, %c3, %c0_13, %c0_14, %c0_15] : memref<1x4x1x16x16xf32, #tpu.memory_space<vmem>>, vector<1x1x1x16x16xf32>
    %10 = vector.shape_cast %9 : vector<1x1x1x16x16xf32> to vector<16x16xf32>
    %11 = tpu.bitcast %10 : vector<16x16xf32> -> vector<16x16xi32>
    %cst = arith.constant 0.000000e+00 : f32
    %12 = vector.broadcast %cst : f32 to vector<16x64xf32>
    %c0_i32 = arith.constant 0 : i32
    %13 = vector.broadcast %c0_i32 : i32 to vector<16x16xi32>
    %14 = arith.shrsi %2, %13 : vector<16x16xi32>
    %c255_i32 = arith.constant 255 : i32
    %15 = vector.broadcast %c255_i32 : i32 to vector<16x16xi32>
    %16 = arith.andi %14, %15 : vector<16x16xi32>
    %17 = arith.sitofp %16 : vector<16x16xi32> to vector<16x16xf32>
    %18 = arith.truncf %17 : vector<16x16xf32> to vector<16x16xbf16>
    %c0_16 = arith.constant 0 : index
    %c0_17 = arith.constant 0 : index
    %19 = vector.load %arg6[%c0_16, %c0_17] : memref<64x64xbf16, #tpu.memory_space<vmem>>, vector<16x64xbf16>
    %cst_18 = arith.constant dense<0.000000e+00> : vector<16x64xf32>
    %20 = tpu.matmul %18, %19, %cst_18 {dimension_numbers = #tpu.dot_dimension_numbers<[1], [0], [0], [1], [0, 0, 1, 1], [], []>} : vector<16x16xbf16>, vector<16x64xbf16>, vector<16x64xf32> -> vector<16x64xf32>
    %21 = arith.addf %12, %20 : vector<16x64xf32>
    %c0_i32_19 = arith.constant 0 : i32
    %22 = vector.broadcast %c0_i32_19 : i32 to vector<16x16xi32>
    %23 = arith.shrsi %5, %22 : vector<16x16xi32>
    %c255_i32_20 = arith.constant 255 : i32
    %24 = vector.broadcast %c255_i32_20 : i32 to vector<16x16xi32>
    %25 = arith.andi %23, %24 : vector<16x16xi32>
    %26 = arith.sitofp %25 : vector<16x16xi32> to vector<16x16xf32>
    %27 = arith.truncf %26 : vector<16x16xf32> to vector<16x16xbf16>
    %c16 = arith.constant 16 : index
    %c0_21 = arith.constant 0 : index
    %28 = vector.load %arg6[%c16, %c0_21] : memref<64x64xbf16, #tpu.memory_space<vmem>>, vector<16x64xbf16>
    %cst_22 = arith.constant dense<0.000000e+00> : vector<16x64xf32>
    %29 = tpu.matmul %27, %28, %cst_22 {dimension_numbers = #tpu.dot_dimension_numbers<[1], [0], [0], [1], [0, 0, 1, 1], [], []>} : vector<16x16xbf16>, vector<16x64xbf16>, vector<16x64xf32> -> vector<16x64xf32>
    %30 = arith.addf %21, %29 : vector<16x64xf32>
    %c0_i32_23 = arith.constant 0 : i32
    %31 = vector.broadcast %c0_i32_23 : i32 to vector<16x16xi32>
    %32 = arith.shrsi %8, %31 : vector<16x16xi32>
    %c255_i32_24 = arith.constant 255 : i32
    %33 = vector.broadcast %c255_i32_24 : i32 to vector<16x16xi32>
    %34 = arith.andi %32, %33 : vector<16x16xi32>
    %35 = arith.sitofp %34 : vector<16x16xi32> to vector<16x16xf32>
    %36 = arith.truncf %35 : vector<16x16xf32> to vector<16x16xbf16>
    %c32 = arith.constant 32 : index
    %c0_25 = arith.constant 0 : index
    %37 = vector.load %arg6[%c32, %c0_25] : memref<64x64xbf16, #tpu.memory_space<vmem>>, vector<16x64xbf16>
    %cst_26 = arith.constant dense<0.000000e+00> : vector<16x64xf32>
    %38 = tpu.matmul %36, %37, %cst_26 {dimension_numbers = #tpu.dot_dimension_numbers<[1], [0], [0], [1], [0, 0, 1, 1], [], []>} : vector<16x16xbf16>, vector<16x64xbf16>, vector<16x64xf32> -> vector<16x64xf32>
    %39 = arith.addf %30, %38 : vector<16x64xf32>
    %c0_i32_27 = arith.constant 0 : i32
    %40 = vector.broadcast %c0_i32_27 : i32 to vector<16x16xi32>
    %41 = arith.shrsi %11, %40 : vector<16x16xi32>
    %c255_i32_28 = arith.constant 255 : i32
    %42 = vector.broadcast %c255_i32_28 : i32 to vector<16x16xi32>
    %43 = arith.andi %41, %42 : vector<16x16xi32>
    %44 = arith.sitofp %43 : vector<16x16xi32> to vector<16x16xf32>
    %45 = arith.truncf %44 : vector<16x16xf32> to vector<16x16xbf16>
    %c48 = arith.constant 48 : index
    %c0_29 = arith.constant 0 : index
    %46 = vector.load %arg6[%c48, %c0_29] : memref<64x64xbf16, #tpu.memory_space<vmem>>, vector<16x64xbf16>
    %cst_30 = arith.constant dense<0.000000e+00> : vector<16x64xf32>
    %47 = tpu.matmul %45, %46, %cst_30 {dimension_numbers = #tpu.dot_dimension_numbers<[1], [0], [0], [1], [0, 0, 1, 1], [], []>} : vector<16x16xbf16>, vector<16x64xbf16>, vector<16x64xf32> -> vector<16x64xf32>
    %48 = arith.addf %39, %47 : vector<16x64xf32>
    %49 = arith.fptosi %48 : vector<16x64xf32> to vector<16x64xi32>
    %c0_i32_31 = arith.constant 0 : i32
    %50 = vector.broadcast %c0_i32_31 : i32 to vector<16x64xi32>
    %51 = arith.shli %49, %50 : vector<16x64xi32>
    %cst_32 = arith.constant 0.000000e+00 : f32
    %52 = vector.broadcast %cst_32 : f32 to vector<16x64xf32>
    %c8_i32 = arith.constant 8 : i32
    %53 = vector.broadcast %c8_i32 : i32 to vector<16x16xi32>
    %54 = arith.shrsi %2, %53 : vector<16x16xi32>
    %c255_i32_33 = arith.constant 255 : i32
    %55 = vector.broadcast %c255_i32_33 : i32 to vector<16x16xi32>
    %56 = arith.andi %54, %55 : vector<16x16xi32>
    %57 = arith.sitofp %56 : vector<16x16xi32> to vector<16x16xf32>
    %58 = arith.truncf %57 : vector<16x16xf32> to vector<16x16xbf16>
    %c0_34 = arith.constant 0 : index
    %c0_35 = arith.constant 0 : index
    %59 = vector.load %arg6[%c0_34, %c0_35] : memref<64x64xbf16, #tpu.memory_space<vmem>>, vector<16x64xbf16>
    %cst_36 = arith.constant dense<0.000000e+00> : vector<16x64xf32>
    %60 = tpu.matmul %58, %59, %cst_36 {dimension_numbers = #tpu.dot_dimension_numbers<[1], [0], [0], [1], [0, 0, 1, 1], [], []>} : vector<16x16xbf16>, vector<16x64xbf16>, vector<16x64xf32> -> vector<16x64xf32>
    %61 = arith.addf %52, %60 : vector<16x64xf32>
    %c8_i32_37 = arith.constant 8 : i32
    %62 = vector.broadcast %c8_i32_37 : i32 to vector<16x16xi32>
    %63 = arith.shrsi %5, %62 : vector<16x16xi32>
    %c255_i32_38 = arith.constant 255 : i32
    %64 = vector.broadcast %c255_i32_38 : i32 to vector<16x16xi32>
    %65 = arith.andi %63, %64 : vector<16x16xi32>
    %66 = arith.sitofp %65 : vector<16x16xi32> to vector<16x16xf32>
    %67 = arith.truncf %66 : vector<16x16xf32> to vector<16x16xbf16>
    %c16_39 = arith.constant 16 : index
    %c0_40 = arith.constant 0 : index
    %68 = vector.load %arg6[%c16_39, %c0_40] : memref<64x64xbf16, #tpu.memory_space<vmem>>, vector<16x64xbf16>
    %cst_41 = arith.constant dense<0.000000e+00> : vector<16x64xf32>
    %69 = tpu.matmul %67, %68, %cst_41 {dimension_numbers = #tpu.dot_dimension_numbers<[1], [0], [0], [1], [0, 0, 1, 1], [], []>} : vector<16x16xbf16>, vector<16x64xbf16>, vector<16x64xf32> -> vector<16x64xf32>
    %70 = arith.addf %61, %69 : vector<16x64xf32>
    %c8_i32_42 = arith.constant 8 : i32
    %71 = vector.broadcast %c8_i32_42 : i32 to vector<16x16xi32>
    %72 = arith.shrsi %8, %71 : vector<16x16xi32>
    %c255_i32_43 = arith.constant 255 : i32
    %73 = vector.broadcast %c255_i32_43 : i32 to vector<16x16xi32>
    %74 = arith.andi %72, %73 : vector<16x16xi32>
    %75 = arith.sitofp %74 : vector<16x16xi32> to vector<16x16xf32>
    %76 = arith.truncf %75 : vector<16x16xf32> to vector<16x16xbf16>
    %c32_44 = arith.constant 32 : index
    %c0_45 = arith.constant 0 : index
    %77 = vector.load %arg6[%c32_44, %c0_45] : memref<64x64xbf16, #tpu.memory_space<vmem>>, vector<16x64xbf16>
    %cst_46 = arith.constant dense<0.000000e+00> : vector<16x64xf32>
    %78 = tpu.matmul %76, %77, %cst_46 {dimension_numbers = #tpu.dot_dimension_numbers<[1], [0], [0], [1], [0, 0, 1, 1], [], []>} : vector<16x16xbf16>, vector<16x64xbf16>, vector<16x64xf32> -> vector<16x64xf32>
    %79 = arith.addf %70, %78 : vector<16x64xf32>
    %c8_i32_47 = arith.constant 8 : i32
    %80 = vector.broadcast %c8_i32_47 : i32 to vector<16x16xi32>
    %81 = arith.shrsi %11, %80 : vector<16x16xi32>
    %c255_i32_48 = arith.constant 255 : i32
    %82 = vector.broadcast %c255_i32_48 : i32 to vector<16x16xi32>
    %83 = arith.andi %81, %82 : vector<16x16xi32>
    %84 = arith.sitofp %83 : vector<16x16xi32> to vector<16x16xf32>
    %85 = arith.truncf %84 : vector<16x16xf32> to vector<16x16xbf16>
    %c48_49 = arith.constant 48 : index
    %c0_50 = arith.constant 0 : index
    %86 = vector.load %arg6[%c48_49, %c0_50] : memref<64x64xbf16, #tpu.memory_space<vmem>>, vector<16x64xbf16>
    %cst_51 = arith.constant dense<0.000000e+00> : vector<16x64xf32>
    %87 = tpu.matmul %85, %86, %cst_51 {dimension_numbers = #tpu.dot_dimension_numbers<[1], [0], [0], [1], [0, 0, 1, 1], [], []>} : vector<16x16xbf16>, vector<16x64xbf16>, vector<16x64xf32> -> vector<16x64xf32>
    %88 = arith.addf %79, %87 : vector<16x64xf32>
    %89 = arith.fptosi %88 : vector<16x64xf32> to vector<16x64xi32>
    %c8_i32_52 = arith.constant 8 : i32
    %90 = vector.broadcast %c8_i32_52 : i32 to vector<16x64xi32>
    %91 = arith.shli %89, %90 : vector<16x64xi32>
    %92 = arith.ori %51, %91 : vector<16x64xi32>
    %cst_53 = arith.constant 0.000000e+00 : f32
    %93 = vector.broadcast %cst_53 : f32 to vector<16x64xf32>
    %c16_i32 = arith.constant 16 : i32
    %94 = vector.broadcast %c16_i32 : i32 to vector<16x16xi32>
    %95 = arith.shrsi %2, %94 : vector<16x16xi32>
    %c255_i32_54 = arith.constant 255 : i32
    %96 = vector.broadcast %c255_i32_54 : i32 to vector<16x16xi32>
    %97 = arith.andi %95, %96 : vector<16x16xi32>
    %98 = arith.sitofp %97 : vector<16x16xi32> to vector<16x16xf32>
    %99 = arith.truncf %98 : vector<16x16xf32> to vector<16x16xbf16>
    %c0_55 = arith.constant 0 : index
    %c0_56 = arith.constant 0 : index
    %100 = vector.load %arg6[%c0_55, %c0_56] : memref<64x64xbf16, #tpu.memory_space<vmem>>, vector<16x64xbf16>
    %cst_57 = arith.constant dense<0.000000e+00> : vector<16x64xf32>
    %101 = tpu.matmul %99, %100, %cst_57 {dimension_numbers = #tpu.dot_dimension_numbers<[1], [0], [0], [1], [0, 0, 1, 1], [], []>} : vector<16x16xbf16>, vector<16x64xbf16>, vector<16x64xf32> -> vector<16x64xf32>
    %102 = arith.addf %93, %101 : vector<16x64xf32>
    %c16_i32_58 = arith.constant 16 : i32
    %103 = vector.broadcast %c16_i32_58 : i32 to vector<16x16xi32>
    %104 = arith.shrsi %5, %103 : vector<16x16xi32>
    %c255_i32_59 = arith.constant 255 : i32
    %105 = vector.broadcast %c255_i32_59 : i32 to vector<16x16xi32>
    %106 = arith.andi %104, %105 : vector<16x16xi32>
    %107 = arith.sitofp %106 : vector<16x16xi32> to vector<16x16xf32>
    %108 = arith.truncf %107 : vector<16x16xf32> to vector<16x16xbf16>
    %c16_60 = arith.constant 16 : index
    %c0_61 = arith.constant 0 : index
    %109 = vector.load %arg6[%c16_60, %c0_61] : memref<64x64xbf16, #tpu.memory_space<vmem>>, vector<16x64xbf16>
    %cst_62 = arith.constant dense<0.000000e+00> : vector<16x64xf32>
    %110 = tpu.matmul %108, %109, %cst_62 {dimension_numbers = #tpu.dot_dimension_numbers<[1], [0], [0], [1], [0, 0, 1, 1], [], []>} : vector<16x16xbf16>, vector<16x64xbf16>, vector<16x64xf32> -> vector<16x64xf32>
    %111 = arith.addf %102, %110 : vector<16x64xf32>
    %c16_i32_63 = arith.constant 16 : i32
    %112 = vector.broadcast %c16_i32_63 : i32 to vector<16x16xi32>
    %113 = arith.shrsi %8, %112 : vector<16x16xi32>
    %c255_i32_64 = arith.constant 255 : i32
    %114 = vector.broadcast %c255_i32_64 : i32 to vector<16x16xi32>
    %115 = arith.andi %113, %114 : vector<16x16xi32>
    %116 = arith.sitofp %115 : vector<16x16xi32> to vector<16x16xf32>
    %117 = arith.truncf %116 : vector<16x16xf32> to vector<16x16xbf16>
    %c32_65 = arith.constant 32 : index
    %c0_66 = arith.constant 0 : index
    %118 = vector.load %arg6[%c32_65, %c0_66] : memref<64x64xbf16, #tpu.memory_space<vmem>>, vector<16x64xbf16>
    %cst_67 = arith.constant dense<0.000000e+00> : vector<16x64xf32>
    %119 = tpu.matmul %117, %118, %cst_67 {dimension_numbers = #tpu.dot_dimension_numbers<[1], [0], [0], [1], [0, 0, 1, 1], [], []>} : vector<16x16xbf16>, vector<16x64xbf16>, vector<16x64xf32> -> vector<16x64xf32>
    %120 = arith.addf %111, %119 : vector<16x64xf32>
    %c16_i32_68 = arith.constant 16 : i32
    %121 = vector.broadcast %c16_i32_68 : i32 to vector<16x16xi32>
    %122 = arith.shrsi %11, %121 : vector<16x16xi32>
    %c255_i32_69 = arith.constant 255 : i32
    %123 = vector.broadcast %c255_i32_69 : i32 to vector<16x16xi32>
    %124 = arith.andi %122, %123 : vector<16x16xi32>
    %125 = arith.sitofp %124 : vector<16x16xi32> to vector<16x16xf32>
    %126 = arith.truncf %125 : vector<16x16xf32> to vector<16x16xbf16>
    %c48_70 = arith.constant 48 : index
    %c0_71 = arith.constant 0 : index
    %127 = vector.load %arg6[%c48_70, %c0_71] : memref<64x64xbf16, #tpu.memory_space<vmem>>, vector<16x64xbf16>
    %cst_72 = arith.constant dense<0.000000e+00> : vector<16x64xf32>
    %128 = tpu.matmul %126, %127, %cst_72 {dimension_numbers = #tpu.dot_dimension_numbers<[1], [0], [0], [1], [0, 0, 1, 1], [], []>} : vector<16x16xbf16>, vector<16x64xbf16>, vector<16x64xf32> -> vector<16x64xf32>
    %129 = arith.addf %120, %128 : vector<16x64xf32>
    %130 = arith.fptosi %129 : vector<16x64xf32> to vector<16x64xi32>
    %c16_i32_73 = arith.constant 16 : i32
    %131 = vector.broadcast %c16_i32_73 : i32 to vector<16x64xi32>
    %132 = arith.shli %130, %131 : vector<16x64xi32>
    %133 = arith.ori %92, %132 : vector<16x64xi32>
    %cst_74 = arith.constant 0.000000e+00 : f32
    %134 = vector.broadcast %cst_74 : f32 to vector<16x64xf32>
    %c24_i32 = arith.constant 24 : i32
    %135 = vector.broadcast %c24_i32 : i32 to vector<16x16xi32>
    %136 = arith.shrsi %2, %135 : vector<16x16xi32>
    %c255_i32_75 = arith.constant 255 : i32
    %137 = vector.broadcast %c255_i32_75 : i32 to vector<16x16xi32>
    %138 = arith.andi %136, %137 : vector<16x16xi32>
    %139 = arith.sitofp %138 : vector<16x16xi32> to vector<16x16xf32>
    %140 = arith.truncf %139 : vector<16x16xf32> to vector<16x16xbf16>
    %c0_76 = arith.constant 0 : index
    %c0_77 = arith.constant 0 : index
    %141 = vector.load %arg6[%c0_76, %c0_77] : memref<64x64xbf16, #tpu.memory_space<vmem>>, vector<16x64xbf16>
    %cst_78 = arith.constant dense<0.000000e+00> : vector<16x64xf32>
    %142 = tpu.matmul %140, %141, %cst_78 {dimension_numbers = #tpu.dot_dimension_numbers<[1], [0], [0], [1], [0, 0, 1, 1], [], []>} : vector<16x16xbf16>, vector<16x64xbf16>, vector<16x64xf32> -> vector<16x64xf32>
    %143 = arith.addf %134, %142 : vector<16x64xf32>
    %c24_i32_79 = arith.constant 24 : i32
    %144 = vector.broadcast %c24_i32_79 : i32 to vector<16x16xi32>
    %145 = arith.shrsi %5, %144 : vector<16x16xi32>
    %c255_i32_80 = arith.constant 255 : i32
    %146 = vector.broadcast %c255_i32_80 : i32 to vector<16x16xi32>
    %147 = arith.andi %145, %146 : vector<16x16xi32>
    %148 = arith.sitofp %147 : vector<16x16xi32> to vector<16x16xf32>
    %149 = arith.truncf %148 : vector<16x16xf32> to vector<16x16xbf16>
    %c16_81 = arith.constant 16 : index
    %c0_82 = arith.constant 0 : index
    %150 = vector.load %arg6[%c16_81, %c0_82] : memref<64x64xbf16, #tpu.memory_space<vmem>>, vector<16x64xbf16>
    %cst_83 = arith.constant dense<0.000000e+00> : vector<16x64xf32>
    %151 = tpu.matmul %149, %150, %cst_83 {dimension_numbers = #tpu.dot_dimension_numbers<[1], [0], [0], [1], [0, 0, 1, 1], [], []>} : vector<16x16xbf16>, vector<16x64xbf16>, vector<16x64xf32> -> vector<16x64xf32>
    %152 = arith.addf %143, %151 : vector<16x64xf32>
    %c24_i32_84 = arith.constant 24 : i32
    %153 = vector.broadcast %c24_i32_84 : i32 to vector<16x16xi32>
    %154 = arith.shrsi %8, %153 : vector<16x16xi32>
    %c255_i32_85 = arith.constant 255 : i32
    %155 = vector.broadcast %c255_i32_85 : i32 to vector<16x16xi32>
    %156 = arith.andi %154, %155 : vector<16x16xi32>
    %157 = arith.sitofp %156 : vector<16x16xi32> to vector<16x16xf32>
    %158 = arith.truncf %157 : vector<16x16xf32> to vector<16x16xbf16>
    %c32_86 = arith.constant 32 : index
    %c0_87 = arith.constant 0 : index
    %159 = vector.load %arg6[%c32_86, %c0_87] : memref<64x64xbf16, #tpu.memory_space<vmem>>, vector<16x64xbf16>
    %cst_88 = arith.constant dense<0.000000e+00> : vector<16x64xf32>
    %160 = tpu.matmul %158, %159, %cst_88 {dimension_numbers = #tpu.dot_dimension_numbers<[1], [0], [0], [1], [0, 0, 1, 1], [], []>} : vector<16x16xbf16>, vector<16x64xbf16>, vector<16x64xf32> -> vector<16x64xf32>
    %161 = arith.addf %152, %160 : vector<16x64xf32>
    %c24_i32_89 = arith.constant 24 : i32
    %162 = vector.broadcast %c24_i32_89 : i32 to vector<16x16xi32>
    %163 = arith.shrsi %11, %162 : vector<16x16xi32>
    %c255_i32_90 = arith.constant 255 : i32
    %164 = vector.broadcast %c255_i32_90 : i32 to vector<16x16xi32>
    %165 = arith.andi %163, %164 : vector<16x16xi32>
    %166 = arith.sitofp %165 : vector<16x16xi32> to vector<16x16xf32>
    %167 = arith.truncf %166 : vector<16x16xf32> to vector<16x16xbf16>
    %c48_91 = arith.constant 48 : index
    %c0_92 = arith.constant 0 : index
    %168 = vector.load %arg6[%c48_91, %c0_92] : memref<64x64xbf16, #tpu.memory_space<vmem>>, vector<16x64xbf16>
    %cst_93 = arith.constant dense<0.000000e+00> : vector<16x64xf32>
    %169 = tpu.matmul %167, %168, %cst_93 {dimension_numbers = #tpu.dot_dimension_numbers<[1], [0], [0], [1], [0, 0, 1, 1], [], []>} : vector<16x16xbf16>, vector<16x64xbf16>, vector<16x64xf32> -> vector<16x64xf32>
    %170 = arith.addf %161, %169 : vector<16x64xf32>
    %171 = arith.fptosi %170 : vector<16x64xf32> to vector<16x64xi32>
    %c24_i32_94 = arith.constant 24 : i32
    %172 = vector.broadcast %c24_i32_94 : i32 to vector<16x64xi32>
    %173 = arith.shli %171, %172 : vector<16x64xi32>
    %174 = arith.ori %133, %173 : vector<16x64xi32>
    %175 = tpu.bitcast %174 : vector<16x64xi32> -> vector<16x64xf32>
    %c0_95 = arith.constant 0 : index
    %c0_96 = arith.constant 0 : index
    %c0_97 = arith.constant 0 : index
    %c0_98 = arith.constant 0 : index
    %176 = vector.load %arg7[%c0_95, %c0_96, %c0_97, %c0_98] : memref<1x1x16x64xf32, #tpu.memory_space<vmem>>, vector<1x1x16x64xf32>
    %177 = vector.shape_cast %176 : vector<1x1x16x64xf32> to vector<16x64xf32>
    %178 = vector.shape_cast %175 : vector<16x64xf32> to vector<1x1x16x64xf32>
    tpu.vector_store %arg7[%c0_95, %c0_96, %c0_97, %c0_98], %178 {strides = array<i32>} : memref<1x1x16x64xf32, #tpu.memory_space<vmem>>, vector<1x1x16x64xf32>,
    return
  }
  func.func @transform_0(%arg0: i32, %arg1: i32, %arg2: i32, %arg3: i32, %arg4: i32) -> (i32, i32, i32, i32, i32) {
    %c0_i32 = arith.constant 0 : i32
    return %arg0, %arg3, %arg1, %arg2, %arg4 : i32, i32, i32, i32, i32
  }
  func.func @transform_1(%arg0: i32, %arg1: i32, %arg2: i32, %arg3: i32, %arg4: i32) -> (i32, i32) {
    %c0_i32 = arith.constant 0 : i32
    %c0_i32_0 = arith.constant 0 : i32
    %c0_i32_1 = arith.constant 0 : i32
    return %c0_i32, %c0_i32_0 : i32, i32
  }
  func.func @transform_2(%arg0: i32, %arg1: i32, %arg2: i32, %arg3: i32, %arg4: i32) -> (i32, i32, i32, i32) {
    %c1_i32 = arith.constant 1 : i32
    %0 = arith.muli %arg3, %c1_i32 : i32
    %1 = arith.addi %0, %arg4 : i32
    %c0_i32 = arith.constant 0 : i32
    return %arg0, %arg1, %arg2, %1 : i32, i32, i32, i32
  }
}

</mosaic_0001>

<bundles_post_ra>
// kernel: pixel_shuffle_align.1
= control target key start
LH: loop header
LB: loop body
LE: loop exit
PB: predicated region body
PF: predicated region fallthrough
CT: control target
= control target key end

     0   :  { %7 = vsyncpa [#allocation3], 0  ;;  %s2021_s0 = inlined_call_operand.hbm [shape: f32[2,4,2,16,16], index: 0, kind: input, shape index: {}]   ;;  %s2022_s1 = inlined_call_operand.vmem [shape: bf16[64,64], index: 1, kind: input, shape index: {}]   ;;  %s2023_s2 = inlined_call_operand.vmem [shape: f32[2,2,16,64], index: 2, kind: output, shape index: {}]  }
   0x1   :  { %9 = vsyncpa [#allocation3 + $0x1], 0  ;;  %s1736_s9 = smov 0   ;;  %s1738_s10 = smov 0  }
   0x2   :  { %s1740_s11 = smov 0   ;;  %s1742_s12 = smov 0  }
   0x3   :  { %s1744_s13 = smov 0   ;;  %s1746_s14 = smov 0  }
   0x4   :  { %s1748_s15 = smov 0   ;;  %s1750_s16 = smov 0  }
   0x5 LB: > { %s44_s17 = sadd.s32 1, %s1703_s14  ;;  %s48_s18 = sadd.s32 1, %s1707_s15  ;;  %s1711_s16 = sphi %s1750_s16, %s15_s16   ;;  %s1707_s15 = sphi %s1748_s15, %s2032_s15   ;;  %s1703_s14 = sphi %s1746_s14, %s2031_s14   ;;  %s1699_s13 = sphi %s1744_s13, %s2030_s13   ;;  %s1695_s12 = sphi %s1742_s12, %s2029_s12   ;;  %s1691_s11 = sphi %s1740_s11, %s2028_s11   ;;  %s1687_s10 = sphi %s1738_s10, %s2027_s10   ;;  %s1683_s9 = sphi %s1736_s9, %s2026_s9  }
   0x6   : > { %p46_p0 = scmp.ge.s32.totalorder %s44_s17, 2  ;;  %s1317_s19 = sadd.s32 4294967295, %s1711_s16  }
   0x7   : > { %p70_p1 = scmp.ne.s32.totalorder %s1691_s11, %s1687_s10  ;;  %p71_p2 = scmp.eq.s32.totalorder %s1711_s16, 0 }
   0x8   : > { %s2034_s17 = smov (%p46_p0, %s44_s17), 0  ;;  %s2036_s18 = smov (!%p46_p0, %s48_s18), %s1707_s15 }
   0x9   : > { %s55_s20 = ssub.s32 %s1703_s14, %s2034_s17  ;;  %p50_p3 = scmp.ge.s32.totalorder %s2036_s18, 2 }
   0xa   : > { %p76_p4 = scmp.ne.s32.totalorder %s1687_s10, %s1683_s9  ;;  %p1786_p5 = por %p71_p2, %p70_p1 }
   0xb   : > { %p77_p6 = scmp.eq.s32.totalorder %s1317_s19, 0  ;;  %s2038_s18 = smov (%p50_p3, %s2036_s18), 0 }
   0xc   : > { %s52_s23 = ssub.s32 %s1707_s15, %s2038_s18  ;;  %s63_s25 = sadd.s32 1, %s1691_s11 }
   0xd   : > { %p1792_p7 = por %p77_p6, %p76_p4  ;;  %s56_s24 = sor.u32 %s55_s20, %s52_s23 }
   0xe   : > { %p61_p8 = scmp.eq.s32.totalorder %s56_s24, 0  ;;  %p1320_p9 = scmp.ge.s32.totalorder %s1711_s16, 4 }
  0x10   : > { %s1800_s26 = scalar_select %p61_p8, %s1691_s11, %s63_s25  }
  0x11   : > { %154 = sbr.rel (%p1320_p9) target bundleno = 40 (0x28), region = 20 }
  0x18   : > { %s158_s27 = sand.u32 1, %s1691_s11   ;;  %s1322_s28 = sshll.u32 %s1703_s14, 1 }
  0x19   : > { %s1321_s29 = sshll.u32 %s158_s27, 6  ;;  %s1323_s30 = sshll.u32 %s1707_s15, 4 }
  0x1a   : > { %s174_s3 = sadd.s32 %s1323_s30, %s1322_s28  ;;  %s162_s4 = scalar_lea.vmem [#allocation2], %s1321_s29 }
  0x1b   : > { %s189_s5 = sshll.u32 %s162_s4, 4  ;;  %s1324_s6 = sshll.u32 %s174_s3, 7  ;;  %s190_s5 = int_to_ptr.vmem [resolvable:$true] %s189_s5 }
  0x1c   : > { %s1560_s7 = scalar_select %p1786_p5, [#allocation0], [#allocation6] }
  0x1d   : > { %s1713_s8 = smov 512   ;;  %s1714_s19 = smov 256  }
  0x1e   : > { %1561 = sst [smem:[#allocation5]] (%p1786_p5), %s1713_s8  ;;  %s1715_s20 = smov 2  }
  0x1f   : > { %s181_s9 = sld [smem:[%s1560_s7]]   ;;  %s1716_s23 = smov 128  }
  0x20   : > { %1562 = sst [smem:[#allocation5 + $0x1]] (%p1786_p5), %s1714_s19  ;;  %s176_s28 = scalar_lea.hbm %s2021_s0, %s1324_s6 }
  0x21   : > { %1563 = sst [smem:[#allocation5 + $0x2]] (%p1786_p5), %s1715_s20  ;;  %s1717_s29 = smov 8  }
  0x22   : > { %1564 = sst [smem:[#allocation5 + $0x3]] (%p1786_p5), %s1716_s23  ;;  %s159_s4 = scalar_lea.sflag [#allocation3], %s158_s27 }
  0x23   : > { %1565 = sst [smem:[#allocation5 + $0x4]] (%p1786_p5), %s1716_s23  ;;  %s1718_s7 = smov [#allocation4]  }
  0x24   : > { %1566 = sst [smem:[#allocation5 + $0x5]] (%p1786_p5), %s1717_s29 }
  0x25   : > { %s1325_s30 = sshll.u32 %s181_s9, 26 }
  0x26   : > { %s1326_s3 = sadd.s32 134217728, %s1325_s30 }
  0x27   : > { %1567 = dma.general (%p1786_p5), %s176_s28, 1024, %s190_s5, %s159_s4, %s1718_s7, [#allocation5], %s1326_s3, 0  }
  0x28 PF: > { %p1327_p10 = scmp.ge.s32.totalorder %s1711_s16, 1  ;;  %p210_p11 = scmp.lt.s32.totalorder %s1711_s16, 5 }
  0x2a   : > { %p211_p12 = pnand %p1327_p10, %p210_p11 }
  0x2b   : > { %s216_s6 = sand.u32 (!%p211_p12), 1, %s1687_s10  }
  0x2c   : > { %214 = sbr.rel (%p211_p12) target bundleno = 365 (0x16d), region = 28  ;;  %s1328_s8 = sshll.u32 (!%p211_p12), %s216_s6, 6 }
  0x2d   : > { %s217_s19 = scalar_lea.sflag (!%p211_p12), [#allocation3], %s216_s6  ;;  %s1828_s20 = scalar_lea.vmem (!%p211_p12), [#allocation2], %s1328_s8 }
  0x33   : > { %1678 = dma.done.wait (%p1792_p7), %s217_s19, 1024  }
  0x34   : > { %1680 = vsyncadd (%p1792_p7), %s217_s19, 4294966272  ;;  %v1719_v0 = vmov 0.0   ;;  %vm1720_vm0 = vmmov 0   ;;  %v1843_v1 = vld [vmem:[%s2022_s1 + $0x8] sm:$0xff]   ;;  %v1846_v2 = vld [vmem:[%s1828_s20 + $0x10] sm:$0xff]  ;;  %vm314_vm1 = vcmask 130048  }
  0x35   : > { %1400 = vmatprep.subr.bf16.mxu0 %v1719_v0  ;;  %1424 = vmatprep.subr.bf16.mxu1 %v1719_v0  ;;  %v1849_v3 = vld [vmem:[%s1828_s20 + $0x18] sm:$0xff]  ;;  %v301_v4 = vand.u32 255, %v1846_v2  ;;  %v536_v6 = vshra.s32 %v1846_v2, 8  ;;  %v1860_v11 = vld [vmem:[%s1828_s20] sm:$0xff]  ;;  %v1863_v12 = vld [vmem:[%s1828_s20 + $0x8] sm:$0xff]  ;;  %v750_v57 = vshra.s32 %v1846_v2, 16 }
  0x36   : > { %1402 = vmatprep.mubr.msk.bf16.mxu0 %vm1720_vm0, %v1719_v0  ;;  %1426 = vmatprep.mubr.msk.bf16.mxu1 %vm1720_vm0, %v1719_v0  ;;  %v302_v5 = vand.u32 255, %v1849_v3  ;;  %v537_v7 = vshra.s32 %v1849_v3, 8  ;;  %v1868_v13 = vld [vmem:[%s2022_s1] sm:$0xff]   ;;  %v529_v18 = vshra.s32 %v1860_v11, 8  ;;  %v530_v19 = vshra.s32 %v1863_v12, 8  ;;  %v1888_v31 = vld [vmem:[%s1828_s20 + $0x28] sm:$0xff] }
  0x37   : > { %1401 = vmatpush3.bf16.msra.mxu0 %v1843_v1  ;;  %1425 = vmatpush3.bf16.msra.mxu1 %v1843_v1  ;;  %v303_v8 = vcvt.s32.f32 %v301_v4  ;;  %v538_v10 = vand.u32 255, %v536_v6  ;;  %v294_v20 = vand.u32 255, %v1860_v11  ;;  %v295_v21 = vand.u32 255, %v1863_v12  ;;  %v1885_v30 = vld [vmem:[%s1828_s20 + $0x20] sm:$0xff]  ;;  %v1893_v32 = vld [vmem:[%s2022_s1 + $0x10] sm:$0xff]   ;;  %v1913_v46 = vld [vmem:[%s1828_s20 + $0x38] sm:$0xff] }
  0x38   : > { %1406 = vmatprep.subr.bf16.mxu0 %v1719_v0  ;;  %1430 = vmatprep.subr.bf16.mxu1 %v1719_v0  ;;  %v304_v9 = vcvt.s32.f32 %v302_v5  ;;  %v539_v14 = vand.u32 255, %v537_v7  ;;  %v531_v23 = vand.u32 255, %v529_v18  ;;  %v532_v24 = vand.u32 255, %v530_v19  ;;  %v1910_v45 = vld [vmem:[%s1828_s20 + $0x30] sm:$0xff]  ;;  %v1918_v47 = vld [vmem:[%s2022_s1 + $0x18] sm:$0xff]   ;;  %p257_p13 = scmp.lt.s32.totalorder %s1699_s13, 1 }
  0x39   : > { %v540_v16 = vcvt.s32.f32 %v538_v10  ;;  %v296_v25 = vcvt.s32.f32 %v294_v20  ;;  %v297_v26 = vcvt.s32.f32 %v295_v21  ;;  %v631_v34 = vshra.s32 %v1885_v30, 8  ;;  %p259_p0 = scmp.lt.s32.totalorder %s1695_s12, 1 }
  0x3a   : > { %v305_v15 = vpack.c.bf16 %v304_v9, %v303_v8  ;;  %v541_v17 = vcvt.s32.f32 %v539_v14  ;;  %v533_v27 = vcvt.s32.f32 %v531_v23  ;;  %v534_v28 = vcvt.s32.f32 %v532_v24  ;;  %s2040_s13 = smov (!%p257_p13, %s1699_s13), 1 }
  0x3b   : > { %v298_v29 = vpack.c.bf16 %v297_v26, %v296_v25  ;;  %v632_v35 = vshra.s32 %v1888_v31, 8  ;;  %v409_v36 = vand.u32 255, %v1885_v30  ;;  %v410_v37 = vand.u32 255, %v1888_v31  ;;  %s2042_s12 = smov (!%p259_p0, %s1695_s12), 1  ;;  %s1330_s29 = sshll.u32 %s2040_s13, 2 }
  0x3c   : > { %1403 = vmatmul.mubr.msk.bf16.vlgmr.msra.gmra.mrb[0].mxu0 %vm314_vm1, %v305_v15  ;;  %v542_v22 = vpack.c.bf16 %v541_v17, %v540_v16  ;;  %v535_v33 = vpack.c.bf16 %v534_v28, %v533_v27  ;;  %v633_v38 = vand.u32 255, %v631_v34  ;;  %v684_v49 = vshra.s32 %v1910_v45, 8  ;;  %s1329_s28 = sshll.u32 %s2042_s12, 1 }
  0x3d   : > { %1407 = vmatpush3.bf16.msra.mxu0 %v1868_v13  ;;  %1408 = vmatprep.mubr.msk.bf16.mxu0 %vm1720_vm0, %v1719_v0  ;;  %v634_v39 = vand.u32 255, %v632_v35  ;;  %v411_v40 = vcvt.s32.f32 %v409_v36  ;;  %v412_v41 = vcvt.s32.f32 %v410_v37  ;;  %v685_v50 = vshra.s32 %v1913_v46, 8  ;;  %s269_s30 = sadd.s32 %s1330_s29, %s1329_s28 }
  0x3e   : > { %1412 = vmatprep.subr.bf16.mxu0 %v1719_v0  ;;  %1427 = vmatmul.mubr.msk.bf16.vlgmr.msra.gmra.mrb[0].mxu1 %vm314_vm1, %v542_v22  ;;  %v635_v42 = vcvt.s32.f32 %v633_v38  ;;  %v468_v51 = vand.u32 255, %v1910_v45  ;;  %v469_v52 = vand.u32 255, %v1913_v46  ;;  %v686_v53 = vand.u32 255, %v684_v49  ;;  %s1331_s3 = sshll.u32 %s269_s30, 3 }
  0x3f   : > { %1431 = vmatpush3.bf16.msra.mxu1 %v1868_v13  ;;  %1432 = vmatprep.mubr.msk.bf16.mxu1 %vm1720_vm0, %v1719_v0  ;;  %v636_v43 = vcvt.s32.f32 %v634_v39  ;;  %v413_v44 = vpack.c.bf16 %v412_v41, %v411_v40  ;;  %v687_v54 = vand.u32 255, %v685_v50  ;;  %v751_v58 = vshra.s32 %v1849_v3, 16  ;;  %s271_s4 = scalar_lea.vmem %s2023_s2, %s1331_s3 }
  0x40   : > { %1436 = vmatprep.subr.bf16.mxu1 %v1719_v0  ;;  %v470_v55 = vcvt.s32.f32 %v468_v51  ;;  %v471_v56 = vcvt.s32.f32 %v469_v52  ;;  %v688_v59 = vcvt.s32.f32 %v686_v53  ;;  %v752_v62 = vand.u32 255, %v750_v57 }
  0x41   : > { %v637_v48 = vpack.c.bf16 %v636_v43, %v635_v42  ;;  %v689_v60 = vcvt.s32.f32 %v687_v54  ;;  %v753_v63 = vand.u32 255, %v751_v58  ;;  %v1356_v5 = vshrl.u32 %v1846_v2, 24 }
  0x42   : > { %v472_v61 = vpack.c.bf16 %v471_v56, %v470_v55  ;;  %v1357_v6 = vshrl.u32 %v1849_v3, 24  ;;  %v754_v7 = vcvt.s32.f32 %v752_v62  ;;  %v743_v3 = vshra.s32 %v1860_v11, 16 }
  0x43   : > { %v690_v4 = vpack.c.bf16 %v689_v60, %v688_v59  ;;  %v755_v8 = vcvt.s32.f32 %v753_v63  ;;  %v968_v9 = vcvt.s32.f32 %v1356_v5  ;;  %v744_v14 = vshra.s32 %v1863_v12, 16 }
  0x44   : > { %v969_v10 = vcvt.s32.f32 %v1357_v6  ;;  %v745_v16 = vand.u32 255, %v743_v3  ;;  %v1355_v18 = vshrl.u32 %v1863_v12, 24  ;;  %v845_v24 = vshra.s32 %v1885_v30, 16 }
  0x45   : > { %v756_v2 = vpack.c.bf16 %v755_v8, %v754_v7  ;;  %v746_v17 = vand.u32 255, %v744_v14  ;;  %v846_v25 = vshra.s32 %v1888_v31, 16  ;;  %v1361_v27 = vshrl.u32 %v1888_v31, 24 }
  0x46   : > { %v970_v15 = vpack.c.bf16 %v969_v10, %v968_v9  ;;  %v747_v19 = vcvt.s32.f32 %v745_v16  ;;  %v962_v22 = vcvt.s32.f32 %v1355_v18  ;;  %v898_v36 = vshra.s32 %v1910_v45, 16 }
  0x47   : > { %v748_v20 = vcvt.s32.f32 %v746_v17  ;;  %v848_v12 = vand.u32 255, %v846_v25  ;;  %v1064_v34 = vcvt.s32.f32 %v1361_v27  ;;  %v899_v37 = vshra.s32 %v1913_v46, 16 }
  0x48   : > { %1409 = vmatmul.mubr.msk.bf16.vlgmr.msra.gmra.mrb[0].mxu0 %vm314_vm1, %v298_v29  ;;  %v1364_v39 = vshrl.u32 %v1913_v46, 24  ;;  %vm1173_vm2 = vcmask 523264  }
  0x49   : > { %1413 = vmatpush3.bf16.msra.mxu0 %v1893_v32  ;;  %1414 = vmatprep.mubr.msk.bf16.mxu0 %vm1720_vm0, %v1719_v0  ;;  %v749_v23 = vpack.c.bf16 %v748_v20, %v747_v19  ;;  %v850_v29 = vcvt.s32.f32 %v848_v12  ;;  %v901_v31 = vand.u32 255, %v899_v37 }
  0x4a   : > { %1418 = vmatprep.subr.bf16.mxu0 %v1719_v0  ;;  %1433 = vmatmul.mubr.msk.bf16.vlgmr.msra.gmra.mrb[0].mxu1 %vm314_vm1, %v535_v33  ;;  %v1117_v43 = vcvt.s32.f32 %v1364_v39 }
  0x4b   : > { %1437 = vmatpush3.bf16.msra.mxu1 %v1893_v32  ;;  %1438 = vmatprep.mubr.msk.bf16.mxu1 %vm1720_vm0, %v1719_v0  ;;  %v903_v41 = vcvt.s32.f32 %v901_v31 }
  0x4c   : > { %1442 = vmatprep.subr.bf16.mxu1 %v1719_v0 }
  0x54   : > { %1415 = vmatmul.mubr.msk.bf16.vlgmr.msra.gmra.mrb[0].mxu0 %vm314_vm1, %v413_v44 }
  0x55   : > { %1419 = vmatpush3.bf16.msra.mxu0 %v1918_v47  ;;  %1420 = vmatprep.mubr.msk.bf16.mxu0 %vm1720_vm0, %v1719_v0 }
  0x56   : > { %1448 = vmatprep.subr.bf16.mxu0 %v1719_v0  ;;  %1439 = vmatmul.mubr.msk.bf16.vlgmr.msra.gmra.mrb[0].mxu1 %vm314_vm1, %v637_v48 }
  0x57   : > { %1443 = vmatpush3.bf16.msra.mxu1 %v1918_v47  ;;  %1444 = vmatprep.mubr.msk.bf16.mxu1 %vm1720_vm0, %v1719_v0 }
  0x58   : > { %1472 = vmatprep.subr.bf16.mxu1 %v1719_v0 }
  0x60   : > { %1421 = vmatmul.mubr.msk.bf16.vlgmr.msra.gmra.mrb[0].mxu0 %vm314_vm1, %v472_v61 }
  0x61   : > { %1449 = vmatpush3.bf16.msra.mxu0 %v1843_v1  ;;  %1450 = vmatprep.mubr.msk.bf16.mxu0 %vm1720_vm0, %v1719_v0 }
  0x62   : > { %1454 = vmatprep.subr.bf16.mxu0 %v1719_v0  ;;  %1445 = vmatmul.mubr.msk.bf16.vlgmr.msra.gmra.mrb[0].mxu1 %vm314_vm1, %v690_v4 }
  0x63   : > { %1473 = vmatpush3.bf16.msra.mxu1 %v1843_v1  ;;  %1474 = vmatprep.mubr.msk.bf16.mxu1 %vm1720_vm0, %v1719_v0  ;;  %v1354_v1 = vshrl.u32 %v1860_v11, 24  ;;  %v847_v11 = vand.u32 255, %v845_v24 }
  0x64   : > { %1478 = vmatprep.subr.bf16.mxu1 %v1719_v0 }
  0x65   : > { %v961_v21 = vcvt.s32.f32 %v1354_v1  ;;  %v849_v28 = vcvt.s32.f32 %v847_v11 }
  0x67   : > { %v963_v26 = vpack.c.bf16 %v962_v22, %v961_v21  ;;  %v851_v35 = vpack.c.bf16 %v850_v29, %v849_v28 }
  0x68   : > { %1451 = vmatmul.mubr.msk.bf16.vlgmr.msra.gmra.mrb[4].mxu0 %vm314_vm1, %v756_v2 }
  0x69   : > { %1455 = vmatpush3.bf16.msra.mxu0 %v1868_v13  ;;  %1456 = vmatprep.mubr.msk.bf16.mxu0 %vm1720_vm0, %v1719_v0 }
  0x6a   : > { %1460 = vmatprep.subr.bf16.mxu0 %v1719_v0  ;;  %1475 = vmatmul.mubr.msk.bf16.vlgmr.msra.gmra.mrb[4].mxu1 %vm314_vm1, %v970_v15 }
  0x6b   : > { %1479 = vmatpush3.bf16.msra.mxu1 %v1868_v13  ;;  %1480 = vmatprep.mubr.msk.bf16.mxu1 %vm1720_vm0, %v1719_v0  ;;  %v1360_v13 = vshrl.u32 %v1885_v30, 24  ;;  %v900_v30 = vand.u32 255, %v898_v36 }
  0x6c   : > { %1484 = vmatprep.subr.bf16.mxu1 %v1719_v0 }
  0x6d   : > { %v1063_v33 = vcvt.s32.f32 %v1360_v13  ;;  %v902_v40 = vcvt.s32.f32 %v900_v30 }
  0x6f   : > { %v1065_v38 = vpack.c.bf16 %v1064_v34, %v1063_v33  ;;  %v904_v44 = vpack.c.bf16 %v903_v41, %v902_v40 }
  0x74   : > { %1457 = vmatmul.mubr.msk.bf16.vlgmr.msra.gmra.mrb[4].mxu0 %vm314_vm1, %v749_v23 }
  0x75   : > { %1461 = vmatpush3.bf16.msra.mxu0 %v1893_v32  ;;  %1462 = vmatprep.mubr.msk.bf16.mxu0 %vm1720_vm0, %v1719_v0 }
  0x76   : > { %1466 = vmatprep.subr.bf16.mxu0 %v1719_v0  ;;  %1481 = vmatmul.mubr.msk.bf16.vlgmr.msra.gmra.mrb[4].mxu1 %vm314_vm1, %v963_v26 }
  0x77   : > { %1485 = vmatpush3.bf16.msra.mxu1 %v1893_v32  ;;  %1486 = vmatprep.mubr.msk.bf16.mxu1 %vm1720_vm0, %v1719_v0  ;;  %v1363_v32 = vshrl.u32 %v1910_v45, 24 }
  0x78   : > { %1490 = vmatprep.subr.bf16.mxu1 %v1719_v0 }
  0x79   : > { %v1116_v42 = vcvt.s32.f32 %v1363_v32 }
  0x7b   : > { %v1118_v48 = vpack.c.bf16 %v1117_v43, %v1116_v42 }
  0x80   : > { %1463 = vmatmul.mubr.msk.bf16.vlgmr.msra.gmra.mrb[4].mxu0 %vm314_vm1, %v851_v35 }
  0x81   : > { %1467 = vmatpush3.bf16.msra.mxu0 %v1918_v47  ;;  %1468 = vmatprep.mubr.msk.bf16.mxu0 %vm1720_vm0, %v1719_v0 }
  0x82   : > { %1487 = vmatmul.mubr.msk.bf16.vlgmr.msra.gmra.mrb[4].mxu1 %vm314_vm1, %v1065_v38 }
  0x83   : > { %1491 = vmatpush3.bf16.msra.mxu1 %v1918_v47  ;;  %1492 = vmatprep.mubr.msk.bf16.mxu1 %vm1720_vm0, %v1719_v0 }
  0x8c   : > { %1469 = vmatmul.mubr.msk.bf16.vlgmr.msra.gmra.mrb[4].mxu0 %vm314_vm1, %v904_v44 }
  0x8e   : > { %1493 = vmatmul.mubr.msk.bf16.vlgmr.msra.gmra.mrb[4].mxu1 %vm314_vm1, %v1118_v48 }
 0x133   : > { %v518_v49 = vpop.f32.mrb[0].mxu0 }
 0x134   : > { %v1422_v50 = vpop.f32.mrb[1].mxu0  ;;  %v1544_v47 = vtrunc.f32 %v518_v49 }
 0x135   : > { %v521_v45 = vpop.f32.mrb[2].mxu0  ;;  %v728_v51 = vpop.f32.mrb[0].mxu1 }
 0x136   : > { %v1423_v46 = vpop.f32.mrb[3].mxu0  ;;  %v1548_v52 = vtrunc.f32 %v728_v51  ;;  %v1446_v53 = vpop.f32.mrb[1].mxu1  ;;  %v1546_v54 = vtrunc.f32 %v521_v45  ;;  %v1545_v58 = vcvt.f32.s32 %v1544_v47 }
 0x137   : > { %v731_v0 = vpop.f32.mrb[2].mxu1 }
 0x138   : > { %v1549_v55 = vcvt.f32.s32 %v1548_v52  ;;  %v1550_v56 = vtrunc.f32 %v731_v0  ;;  %v1447_v57 = vpop.f32.mrb[3].mxu1  ;;  %v1547_v61 = vcvt.f32.s32 %v1546_v54 }
 0x13a   : > { %v739_v59 = vshll.u32 %v1549_v55, 8  ;;  %v1551_v60 = vcvt.f32.s32 %v1550_v56 }
 0x13c   : > { %v741_v62 = vor.u32 %v1545_v58, %v739_v59  ;;  %v740_v63 = vshll.u32 %v1551_v60, 8 }
 0x13e   : > { %v742_v4 = vor.u32 %v1547_v61, %v740_v63 }
 0x15f   : > { %v942_v5 = vpop.f32.mrb[4].mxu0 }
 0x160   : > { %v1552_v6 = vtrunc.f32 %v942_v5  ;;  %v1470_v7 = vpop.f32.mrb[5].mxu0 }
 0x161   : > { %v945_v8 = vpop.f32.mrb[6].mxu0  ;;  %v1156_v2 = vpop.f32.mrb[4].mxu1 }
 0x162   : > { %v1553_v9 = vcvt.f32.s32 %v1552_v6  ;;  %v1554_v10 = vtrunc.f32 %v945_v8  ;;  %v1471_v3 = vpop.f32.mrb[7].mxu0  ;;  %v1556_v14 = vtrunc.f32 %v1156_v2  ;;  %v1494_v15 = vpop.f32.mrb[5].mxu1 }
 0x163   : > { %v1159_v1 = vpop.f32.mrb[6].mxu1 }
 0x164   : > { %v953_v16 = vshll.u32 %v1553_v9, 16  ;;  %v1555_v17 = vcvt.f32.s32 %v1554_v10  ;;  %v1557_v18 = vcvt.f32.s32 %v1556_v14  ;;  %v1558_v19 = vtrunc.f32 %v1159_v1  ;;  %v1495_v20 = vpop.f32.mrb[7].mxu1 }
 0x166   : > { %v955_v21 = vor.u32 %v953_v16, %v741_v62  ;;  %v954_v22 = vshll.u32 %v1555_v17, 16  ;;  %v1167_v23 = vshll.u32 %v1557_v18, 24  ;;  %v1559_v24 = vcvt.f32.s32 %v1558_v19 }
 0x168   : > { %v956_v25 = vor.u32 %v954_v22, %v742_v4  ;;  %v1169_v26 = vor.u32 %v1167_v23, %v955_v21  ;;  %v1168_v11 = vshll.u32 %v1559_v24, 24 }
 0x16a   : > { %1174 = vst.msk [vmem:[%s271_s4] sm:$0xff] %vm1173_vm2, %v1169_v26  ;;  %v1170_v12 = vor.u32 %v1168_v11, %v956_v25 }
 0x16c   : > { %1175 = vst.msk [vmem:[%s271_s4 + $0x8] sm:$0xff] %vm1173_vm2, %v1170_v12 }
 0x16d PF: > { %s15_s16 = sadd.s32 1, %s1711_s16   ;;  %s2026_s9 = smov %s1687_s10 }
 0x16e   : > { %p12_p1 = scmp.ge.s32.totalorder %s15_s16, 6   ;;  %s2027_s10 = smov %s1691_s11 }
 0x16f   : > { %s2028_s11 = smov %s1800_s26  ;;  %s2029_s12 = smov %s1703_s14 }
 0x170   : > { %s2030_s13 = smov %s1707_s15  ;;  %s2031_s14 = smov %s2034_s17 }
 0x171   : > { %s2032_s15 = smov %s2038_s18  ;;  %14 = sbr.rel (!%p12_p1) target bundleno = 5 (0x5), region = 76 }
 0x178   :  { %1223 = vsyncpa [#allocation3], 1 }
 0x179   :  { %1225 = vsyncpa [#allocation3 + $0x1], 1 }

</bundles_post_ra>
